<compile_context>
chip_gen: v7x
topology: tpu7x:2x2x1
jax: 0.10.0
libtpu: 0.0.40
codegen_flags: <defaults>
</compile_context>

<pallas_src>
import jax
import jax.numpy as jnp
from jax.experimental import pallas as pl
from jax.experimental.pallas import tpu as pltpu


def _softmax_kernel(x_ref, o_ref):
    # x_ref / o_ref: (BN, C, T_HW) lane-dense tile in VMEM.
    # Softmax over the channel axis (axis=1). Every (batch, spatial-column)
    # pair is independent, so tiling / boundary masking on axes 0 and 2 can
    # never split or pollute the reduction (tail-block garbage columns are
    # simply not written back).
    x = x_ref[...].astype(jnp.float32)
    m = jnp.max(x, axis=1, keepdims=True)
    e = jnp.exp(x - m)
    s = jnp.sum(e, axis=1, keepdims=True)
    o_ref[...] = (e * pl.reciprocal(s, approx=False)).astype(o_ref.dtype)


def _round_up(v: int, m: int) -> int:
    return ((v + m - 1) // m) * m


def _vmem_limit_bytes() -> int:
    """Generation-aware scoped-VMEM limit (128 MiB phys on v5e/v6e, 64 MiB on v7x)."""
    try:
        cap = int(pltpu.get_tpu_info().vmem_capacity_bytes)
    except Exception:
        cap = 64 * 1024 * 1024  # safe floor (v7x physical capacity)
    # Leave half the physical VMEM for compiler scratch / other users:
    # v5e/v6e -> 64 MiB, v7x -> 32 MiB.
    return int(min(cap // 2, 64 * 1024 * 1024))


def _choose_blocks(n: int, c: int, hw: int, dtype_bytes: int, vmem_limit: int):
    """Pick (batch_block, spatial_block) for a (N, C, HW) softmax-over-C kernel."""
    # Sublane packing granule for the second-to-last (C) axis:
    # f32 -> 8, bf16 -> 16, int8/fp8 -> 32.
    granule = max(8, 32 // max(1, dtype_bytes))
    c_pad = _round_up(c, granule)

    # Per-block *input* byte budget. Live set is roughly
    #   2x(in + out) double-buffered blocks + ~3x f32 temporaries
    # i.e. ~7-10x the input block, so vmem_limit // 24 keeps us comfortably
    # inside the scoped limit on every generation; blocks past ~2 MiB buy <2%
    # of the HBM roofline anyway.
    budget = max(256 * 1024, min(2 * 1024 * 1024, vmem_limit // 24))

    per_batch_bytes = c_pad * hw * dtype_bytes
    if per_batch_bytes <= budget:
        # Small feature maps: fold several batch elements into one block so
        # each grid step moves enough bytes to amortize the ~0.35 us per-step
        # overhead, with fully contiguous DMAs across N.
        bn = min(n, max(1, budget // per_batch_bytes))
        t_hw = hw
    else:
        bn = 1
        if hw <= 128:
            t_hw = hw  # full-extent last dim (legal even when < 128)
        else:
            t_hw = (budget // max(1, c_pad * dtype_bytes)) // 128 * 128
            t_hw = max(128, min(t_hw, _round_up(hw, 128)))
            if t_hw >= hw:
                t_hw = hw

    # Keep both v7x TensorCores busy: ensure >= 2 grid steps whenever the
    # problem is splittable (one extra step costs ~0.35 us on any chip).
    if pl.cdiv(n, bn) * pl.cdiv(hw, t_hw) == 1:
        if n >= 2:
            bn = pl.cdiv(n, 2)
        elif hw >= 256:
            t_hw = _round_up(pl.cdiv(hw, 2), 128)

    return bn, t_hw


def softmax_nchw(x: jax.Array) -> jax.Array:
    """Softmax over the channel axis (dim=1) of an NCHW tensor, via Pallas."""
    assert x.ndim == 4, "expected NCHW input (implicit softmax dim = 1)"
    n, c, h, w = x.shape
    hw = h * w
    dtype_bytes = jnp.dtype(x.dtype).itemsize

    # Lane-dense layout: (N, C, H*W) — wrapper-side layout plumbing only.
    x3 = x.reshape(n, c, hw)

    vmem_limit = _vmem_limit_bytes()
    bn, t_hw = _choose_blocks(n, c, hw, dtype_bytes, vmem_limit)
    grid = (pl.cdiv(n, bn), pl.cdiv(hw, t_hw))

    cost = pl.CostEstimate(
        flops=4 * n * c * hw,
        transcendentals=n * c * hw,
        bytes_accessed=2 * n * c * hw * dtype_bytes,
    )

    out3 = pl.pallas_call(
        _softmax_kernel,
        out_shape=jax.ShapeDtypeStruct((n, c, hw), x.dtype),
        grid_spec=pltpu.PrefetchScalarGridSpec(
            num_scalar_prefetch=0,
            grid=grid,
            in_specs=[pl.BlockSpec((bn, c, t_hw), lambda i, j: (i, 0, j))],
            out_specs=pl.BlockSpec((bn, c, t_hw), lambda i, j: (i, 0, j)),
        ),
        compiler_params=pltpu.CompilerParams(
            # Both axes independent (the C reduction lives inside a block):
            # pipeline across tiles and shard across v7x's 2 TensorCores.
            dimension_semantics=("parallel", "parallel"),
            vmem_limit_bytes=vmem_limit,
        ),
        cost_estimate=cost,
    )(x3)

    return out3.reshape(n, c, h, w)


if __name__ == "__main__":
    key = jax.random.PRNGKey(0)

    # Primary check: small NCHW input consistent with the module's forward.
    x = jax.random.normal(key, (2, 4, 16, 16), dtype=jnp.float32)
    out = jax.block_until_ready(softmax_nchw(x))
    ref = jax.nn.softmax(x, axis=1)
    assert out.shape == x.shape and out.dtype == x.dtype
    assert jnp.allclose(out, ref, atol=1e-6, rtol=1e-6), "mismatch vs reference"

    # Secondary check: awkward sizes exercise the masked tail blocks
    # (batch block does not divide N, HW not a multiple of 128).
    x2 = jax.random.normal(jax.random.PRNGKey(1), (3, 5, 9, 7), dtype=jnp.float32)
    out2 = jax.block_until_ready(softmax_nchw(x2))
    ref2 = jax.nn.softmax(x2, axis=1)
    assert jnp.allclose(out2, ref2, atol=1e-6, rtol=1e-6), "mismatch vs reference (tail)"

    print("KERNEL_OK")
</pallas_src>

<mosaic_0001>
module attributes {stable_mosaic.version = 11 : i64} {
  func.func @_softmax_kernel(%arg0: i32, %arg1: i32, %arg2: memref<1x4x256xf32, #tpu.memory_space<vmem>>, %arg3: memref<1x4x256xf32, #tpu.memory_space<vmem>>) attributes {dimension_semantics = [#tpu.dimension_semantics<parallel>, #tpu.dimension_semantics<parallel>], iteration_bounds = array<i64: 2, 1>, scalar_prefetch = 0 : i64, scratch_operands = 0 : i64, tpu.core_type = #tpu.core_type<tc>, window_params = [{transform_indices = @transform_0, window_bounds = array<i64: 1, 4, 256>}, {transform_indices = @transform_1, window_bounds = array<i64: 1, 4, 256>}]} {
    %c0 = arith.constant 0 : index
    %c0_0 = arith.constant 0 : index
    %c0_1 = arith.constant 0 : index
    %0 = vector.load %arg2[%c0, %c0_0, %c0_1] : memref<1x4x256xf32, #tpu.memory_space<vmem>>, vector<1x4x256xf32>
    %cst = arith.constant dense<0xFF800000> : vector<1x256xf32>
    %1 = vector.multi_reduction <maximumf>, %0, %cst [1] : vector<1x4x256xf32> to vector<1x256xf32>
    %2 = vector.shape_cast %1 : vector<1x256xf32> to vector<1x1x256xf32>
    %3 = vector.broadcast %2 : vector<1x1x256xf32> to vector<1x4x256xf32>
    %4 = arith.subf %0, %3 : vector<1x4x256xf32>
    %5 = math.exp %4 : vector<1x4x256xf32>
    %cst_2 = arith.constant dense<0.000000e+00> : vector<1x256xf32>
    %6 = vector.multi_reduction <add>, %5, %cst_2 [1] : vector<1x4x256xf32> to vector<1x256xf32>
    %7 = vector.shape_cast %6 : vector<1x256xf32> to vector<1x1x256xf32>
    %8 = tpu.reciprocal %7 : vector<1x1x256xf32> -> vector<1x1x256xf32>
    %9 = vector.broadcast %8 : vector<1x1x256xf32> to vector<1x4x256xf32>
    %10 = arith.mulf %5, %9 : vector<1x4x256xf32>
    %c0_3 = arith.constant 0 : index
    %c0_4 = arith.constant 0 : index
    %c0_5 = arith.constant 0 : index
    %11 = vector.load %arg3[%c0_3, %c0_4, %c0_5] : memref<1x4x256xf32, #tpu.memory_space<vmem>>, vector<1x4x256xf32>
    tpu.vector_store %arg3[%c0_3, %c0_4, %c0_5], %10 {strides = array<i32>} : memref<1x4x256xf32, #tpu.memory_space<vmem>>, vector<1x4x256xf32>,
    return
  }
  func.func @transform_0(%arg0: i32, %arg1: i32) -> (i32, i32, i32) {
    %c0_i32 = arith.constant 0 : i32
    %c0_i32_0 = arith.constant 0 : i32
    return %arg0, %c0_i32, %arg1 : i32, i32, i32
  }
  func.func @transform_1(%arg0: i32, %arg1: i32) -> (i32, i32, i32) {
    %c0_i32 = arith.constant 0 : i32
    %c0_i32_0 = arith.constant 0 : i32
    return %arg0, %c0_i32, %arg1 : i32, i32, i32
  }
}

</mosaic_0001>

<bundles_post_ra>
// kernel: tpu_custom_call.1
= control target key start
LH: loop header
LB: loop body
LE: loop exit
PB: predicated region body
PF: predicated region fallthrough
CT: control target
= control target key end

     0   :  { %6 = vsyncpa [#allocation3], 0  ;;  %s697_s0 = inlined_call_operand.hbm [shape: f32[2,4,256], index: 0, kind: input, shape index: {}]   ;;  %s698_s1 = inlined_call_operand.hbm [shape: f32[2,4,256], index: 1, kind: output, shape index: {}]  }
   0x1   :  { %8 = vsyncpa [#allocation3 + $0x1], 0 }
   0x2   :  { %9 = vsyncpa [#allocation4], 0 }
   0x3   :  { %11 = vsyncpa [#allocation4 + $0x1], 0  ;;  %s517_s6 = smov 0   ;;  %s519_s7 = smov 0  }
   0x4   :  { %s521_s8 = smov 0   ;;  %s523_s9 = smov 0  }
   0x5   :  { %s525_s10 = smov 0   ;;  %s527_s11 = smov 0  }
   0x6 LB: > { %s305_s12 = sadd.s32 4294967295, %s503_s11   ;;  %s306_s13 = sadd.s32 4294967294, %s503_s11   ;;  %s503_s11 = sphi %s527_s11, %s17_s11   ;;  %s499_s10 = sphi %s525_s10, %s714_s10   ;;  %s495_s9 = sphi %s523_s9, %s713_s9   ;;  %s491_s8 = sphi %s521_s8, %s712_s8   ;;  %s487_s7 = sphi %s519_s7, %s711_s7   ;;  %s483_s6 = sphi %s517_s6, %s710_s6  }
   0x7   : > { %s29_s14 = sadd.s32 1, %s499_s10  ;;  %s38_s15 = sadd.s32 1, %s491_s8 }
   0x8   : > { %p31_p0 = scmp.ge.s32.totalorder %s29_s14, 2  ;;  %p45_p1 = scmp.ne.s32.totalorder %s491_s8, %s487_s7 }
   0x9   : > { %p46_p2 = scmp.eq.s32.totalorder %s503_s11, 0  ;;  %p51_p3 = scmp.ne.s32.totalorder %s487_s7, %s483_s6 }
   0xa   : > { %s716_s14 = smov (%p31_p0, %s29_s14), 0  ;;  %p52_p5 = scmp.eq.s32.totalorder %s305_s12, 0 }
   0xb   : > { %p558_p4 = por %p46_p2, %p45_p1  ;;  %s33_s17 = ssub.s32 %s499_s10, %s716_s14 }
   0xc   : > { %p77_p6 = scmp.eq.s32.totalorder %s305_s12, 1  ;;  %p36_p7 = scmp.eq.s32.totalorder %s33_s17, 0 }
   0xd   : > { %p564_p8 = por %p52_p5, %p51_p3  ;;  %p83_p10 = scmp.eq.s32.totalorder %s306_s13, 1 }
   0xe   : > { %p568_p9 = por %p77_p6, %p45_p1  ;;  %p334_p13 = scmp.lt.s32.totalorder %s503_s11, 2 }
   0xf   : > { %s573_s20 = scalar_select %p36_p7, %s491_s8, %s38_s15  }
  0x10   : > { %s702_s19 = scalar_select %p568_p9, 1, 0 }
  0x11   : > { %p575_p11 = por %p83_p10, %p51_p3  ;;  %s103_s22 = sand.u32 1, %s491_s8  }
  0x12   : > { %s309_s23 = sshll.u32 %s103_s22, 3  ;;  %s320_s24 = sshll.u32 %s499_s10, 7 }
  0x13   : > { %s703_s21 = scalar_select %p575_p11, 1, 0 }
  0x14   : > { %s586_s27 = scalar_lea.hbm %s697_s0, %s320_s24  ;;  %s107_s28 = scalar_lea.vmem [#allocation2], %s309_s23 }
  0x15   : > { %s117_s29 = sshll.u32 %s107_s28, 4  ;;  %p592_p0 = pnand %p334_p13, %p558_p4  ;;  %s588_s29 = int_to_ptr.vmem [resolvable:$true] %s117_s29 }
  0x16   : > { %s104_s2 = scalar_lea.sflag [#allocation3], %s103_s22  ;;  %s391_s3 = scalar_lea.hbm %s586_s27, 128 }
  0x17   : > { %p392_p3 = scmp.ne.s32.totalorder %s586_s27, %s391_s3  ;;  %p393_p5 = pneg %p592_p0 }
  0x18   : > { %s396_s12 = scalar_lea.hbm %s697_s0, 256  ;;  %p397_p4 = scmp.lt.u32.totalorder %s586_s27, %s697_s0 }
  0x19   : > { %p394_p6 = pnand %p393_p5, %p392_p3  ;;  %p398_p10 = scmp.lt.u32.totalorder %s396_s12, %s391_s3 }
  0x1a   : > { %p400_p12 = scmp.lt.u32.totalorder %s391_s3, %s586_s27 }
  0x1b   : > { %p395_p7 = pneg %p394_p6  ;;  %p399_p13 = por %p398_p10, %p397_p4 }
  0x1d   : > { %p401_p1 = por %p400_p12, %p399_p13 }
  0x1f   : > { %p402_p2 = pnand %p401_p1, %p395_p7 }
  0x21   : > { %405 = shalt.err (!%p402_p2)
}
  0x22   : > { %s406_s16 = scalar_lea.vmem %s588_s29, 128  ;;  %s505_s17 = smov [#allocation2]  }
  0x23   : > { %p407_p3 = scmp.ne.s32.totalorder %s588_s29, %s406_s16  ;;  %s411_s22 = sshll.u32 %s505_s17, 4  ;;  %s412_s22 = int_to_ptr.vmem [resolvable:$false] %s411_s22 }
  0x24   : > { %s413_s23 = scalar_lea.vmem %s412_s22, 256  ;;  %p414_p9 = scmp.lt.s32.totalorder %s588_s29, %s412_s22 }
  0x25   : > { %p409_p6 = pnand %p407_p3, %p393_p5  ;;  %p415_p4 = scmp.lt.s32.totalorder %s413_s23, %s406_s16 }
  0x27   : > { %p410_p11 = pneg %p409_p6  ;;  %p416_p10 = por %p415_p4, %p414_p9 }
  0x29   : > { %p417_p12 = pnand %p416_p10, %p410_p11 }
  0x2b   : > { %420 = shalt.err (!%p417_p12)
}
  0x2c   : > { %329 = dma.hbm_to_vmem [thread:$0]  (!%p592_p0), %s586_s27, 128, %s588_s29, %s104_s2  }
  0x2d   : > { %p705_p1 = scmp.lt.s32.totalorder %s503_s11, 3  ;;  %p706_p2 = scmp.ge.s32.totalorder %s503_s11, 1 }
  0x2f   : > { %p123_p5 = pnand %p706_p2, %p705_p1 }
  0x30   : > { %s628_s24 = sand.u32 (!%p123_p5), 1, %s487_s7  }
  0x31   : > { %126 = sbr.rel (%p123_p5) target bundleno = 134 (0x86), region = 24  ;;  %s313_s25 = sshll.u32 (!%p123_p5), %s628_s24, 3 }
  0x32   : > { %s129_s26 = scalar_lea.sflag (!%p123_p5), [#allocation3], %s628_s24  ;;  %s132_s28 = scalar_lea.vmem (!%p123_p5), [#allocation2], %s313_s25 }
  0x38   : > { %474 = dma.done.wait (%p564_p8), %s129_s26, 128  }
  0x39   : > { %476 = vsyncadd (%p564_p8), %s129_s26, 4294967168  ;;  %vm157_vm0 = vcmask 1043456   ;;  %v153_v0 = vld [vmem:[%s132_s28] sm:$0xff]  ;;  %s150_s18 = scalar_lea.vmem [#allocation5], %s313_s25  ;;  %s321_s29 = sshll.u32 %s495_s9, 7 }
  0x3a   : > { %v155_v1 = vcombine.high %v153_v0, %v153_v0  ;;  %v158_v2 = vsel %vm157_vm0, %v153_v0, -inf  ;;  %s221_s27 = sshll.u32 %s150_s18, 4  ;;  %s650_s3 = scalar_lea.hbm %s698_s1, %s321_s29  ;;  %s645_s27 = int_to_ptr.vmem [resolvable:$true] %s221_s27 }
  0x3b   : > { %v159_v3 = vrot.slane %v158_v2, 4  ;;  %s205_s4 = scalar_lea.sflag [#allocation4], %s628_s24  ;;  %s421_s5 = scalar_lea.vmem %s645_s27, 128 }
  0x3c   : > { %v165_v4 = vsel %vm157_vm0, %v155_v1, -inf  ;;  %p422_p8 = scmp.ne.s32.totalorder %s645_s27, %s421_s5  ;;  %p707_p9 = scmp.ne.s32.totalorder %s702_s19, 0 }
  0x3d   : > { %v160_v5 = vmax.f32 %v158_v2, %v159_v3  ;;  %v166_v6 = vrot.slane %v165_v4, 4  ;;  %s506_s9 = smov [#allocation5]  }
  0x3e   : > { %p423_p11 = pnand %p422_p8, %p707_p9  ;;  %s425_s12 = sshll.u32 %s506_s9, 4  ;;  %s426_s12 = int_to_ptr.vmem [resolvable:$false] %s425_s12 }
  0x3f   : > { %v161_v7 = vrot.slane %v160_v5, 2  ;;  %v167_v8 = vmax.f32 %v165_v4, %v166_v6  ;;  %s427_s13 = scalar_lea.vmem %s426_s12, 256  ;;  %p428_p7 = scmp.lt.s32.totalorder %s645_s27, %s426_s12 }
  0x40   : > { %p424_p0 = pneg %p423_p11  ;;  %p429_p13 = scmp.lt.s32.totalorder %s427_s13, %s421_s5 }
  0x41   : > { %v162_v9 = vmax.f32 %v160_v5, %v161_v7  ;;  %v168_v10 = vrot.slane %v167_v8, 2 }
  0x42   : > { %p430_p3 = por %p429_p13, %p428_p7 }
  0x43   : > { %v163_v11 = vrot.slane %v162_v9, 1  ;;  %v169_v12 = vmax.f32 %v167_v8, %v168_v10 }
  0x44   : > { %p431_p6 = pnand %p430_p3, %p424_p0 }
  0x45   : > { %v164_v13 = vmax.f32 %v162_v9, %v163_v11  ;;  %v170_v14 = vrot.slane %v169_v12, 1 }
  0x47   : > { %v171_v15 = vmax.f32 %v169_v12, %v170_v14 }
  0x49   : > { %v174_v16 = vcombine.low %v164_v13, %v171_v15 }
  0x4b   : > { %v176_v17 = vsub.f32 %v153_v0, %v174_v16 }
  0x4d   : > { %v177_v18 = vmul.f32 1.442695, %v176_v17 }
  0x4f   : > { %385 = vpow2.f32 %v177_v18 }
  0x59   : > { %v386_v19 = vpop.eup %385 }
  0x5a   : > { %v180_v20 = vcombine.high %v386_v19, %v386_v19  ;;  %v182_v21 = vsel %vm157_vm0, %v386_v19, 0.0 }
  0x5b   : > { %v183_v22 = vrot.slane %v182_v21, 4 }
  0x5c   : > { %v189_v23 = vsel %vm157_vm0, %v180_v20, 0.0 }
  0x5d   : > { %v184_v24 = vadd.f32 %v183_v22, %v182_v21  ;;  %v190_v25 = vrot.slane %v189_v23, 4 }
  0x5f   : > { %v185_v26 = vrot.slane %v184_v24, 2  ;;  %v191_v27 = vadd.f32 %v190_v25, %v189_v23 }
  0x61   : > { %v186_v28 = vadd.f32 %v185_v26, %v184_v24  ;;  %v192_v29 = vrot.slane %v191_v27, 2 }
  0x63   : > { %v187_v30 = vrot.slane %v186_v28, 1  ;;  %v193_v31 = vadd.f32 %v192_v29, %v191_v27 }
  0x65   : > { %v188_v32 = vadd.f32 %v187_v30, %v186_v28  ;;  %v194_v33 = vrot.slane %v193_v31, 1 }
  0x67   : > { %v195_v34 = vadd.f32 %v194_v33, %v193_v31  ;;  %387 = vrcp.f32 %v188_v32 }
  0x69   : > { %389 = vrcp.f32 %v195_v34 }
  0x71   : > { %v388_v35 = vpop.eup %387 }
  0x73   : > { %v390_v36 = vpop.eup %389 }
  0x74   : > { %v200_v37 = vcombine.low %v388_v35, %v390_v36 }
  0x76   : > { %v202_v38 = vmul.f32 %v386_v19, %v200_v37 }
  0x78   : > { %203 = vst [vmem:[%s150_s18] sm:$0xff] %v202_v38 }
  0x79   : > { %434 = shalt.err (!%p431_p6)
}
  0x7a   : > { %s435_s15 = scalar_lea.hbm %s650_s3, 128  ;;  %s439_s22 = scalar_lea.hbm %s698_s1, 256 }
  0x7b   : > { %p436_p4 = scmp.ne.s32.totalorder %s650_s3, %s435_s15  ;;  %p440_p1 = scmp.lt.u32.totalorder %s650_s3, %s698_s1 }
  0x7c   : > { %p441_p2 = scmp.lt.u32.totalorder %s439_s22, %s435_s15  ;;  %p443_p8 = scmp.lt.u32.totalorder %s435_s15, %s650_s3 }
  0x7d   : > { %p437_p10 = pnand %p436_p4, %p707_p9 }
  0x7e   : > { %p442_p5 = por %p441_p2, %p440_p1 }
  0x7f   : > { %p438_p12 = pneg %p437_p10 }
  0x80   : > { %p444_p11 = por %p443_p8, %p442_p5 }
  0x82   : > { %p445_p0 = pnand %p444_p11, %p438_p12 }
  0x84   : > { %448 = shalt.err (!%p445_p0)
}
  0x85   : > { %324 = dma.vmem_to_hbm [thread:$0]  (%p707_p9), %s645_s27, 128, %s650_s3, %s205_s4  }
  0x86 PF: > { %s233_s25 = sand.u32 1, %s483_s6   ;;  %p708_p7 = scmp.ne.s32.totalorder %s703_s21, 0 }
  0x87   : > { %p709_p13 = scmp.ge.s32.totalorder %s503_s11, 2  ;;  %s234_s26 = scalar_lea.sflag [#allocation4], %s233_s25 }
  0x89   : > { %p331_p3 = pnand %p709_p13, %p708_p7 }
  0x8b   : > { %478 = dma.done.wait (!%p331_p3), %s234_s26, 128  }
  0x8c   : > { %480 = vsyncadd (!%p331_p3), %s234_s26, 4294967168  ;;  %s17_s11 = sadd.s32 1, %s503_s11   ;;  %s710_s6 = smov %s487_s7 }
  0x8d   : > { %p14_p6 = scmp.ge.s32.totalorder %s17_s11, 4   ;;  %s711_s7 = smov %s491_s8 }
  0x8e   : > { %s712_s8 = smov %s573_s20  ;;  %s713_s9 = smov %s499_s10 }
  0x8f   : > { %s714_s10 = smov %s716_s14  ;;  %16 = sbr.rel (!%p14_p6) target bundleno = 6 (0x6), region = 69 }
  0x96   :  { %239 = vsyncpa [#allocation3], 1 }
  0x97   :  { %241 = vsyncpa [#allocation3 + $0x1], 1 }
  0x98   :  { %242 = vsyncpa [#allocation4], 1 }
  0x99   :  { %244 = vsyncpa [#allocation4 + $0x1], 1 }

</bundles_post_ra>
